<compile_context>
chip_gen: v7x
topology: tpu7x:2x2x1
jax: 0.10.0
libtpu: 0.0.40
codegen_flags: <defaults>
</compile_context>

<pallas_src>
import functools

import jax
import jax.numpy as jnp
from jax.experimental import pallas as pl
from jax.experimental.pallas import tpu as pltpu


def _gwse_kernel(x_ref, w_ref, b_ref, o_ref, *, G, Cg, Co, K, pad, L):
    """One grid step = Tb batches; all groups / input channels / taps fused.

    x_ref : (Tb, C, L)        VMEM   L = H * W_out lanes per (batch, channel) row
    w_ref : (G*Cg*K, Co, L)   VMEM   per-(g,cg,k) per-lane weight rows
                                     (width-boundary masks folded in as zeros)
    b_ref : (G, Co, 1)        VMEM   biases
    o_ref : (Tb, G, Co, L)    VMEM   output slab
    """
    x = x_ref[...].astype(jnp.float32)            # single wide load + f32 accum dtype

    # K lane-rotations of the whole tile (XLU); lanes that wrap across H-row /
    # width boundaries are killed by the zeros baked into the weight rows.
    xk = []
    for k in range(K):
        s = (pad - k) % L
        xk.append(x if s == 0 else pltpu.roll(x, s, axis=2))

    for g in range(G):
        acc = None
        for cg in range(Cg):
            c = g * Cg + cg
            for k in range(K):
                t = (g * Cg + cg) * K + k
                xs = xk[k][:, c:c + 1, :]          # (Tb, 1, L)   128-lane wide
                term = w_ref[t] * xs               # (Co, L)*(Tb,1,L) -> (Tb, Co, L)
                acc = term if acc is None else acc + term
        acc = acc + b_ref[g]                       # (Co, 1) broadcast over lanes/batch
        o_ref[:, g, :, :] = acc.astype(o_ref.dtype)


def _pick_batch_tile(B, batch_tile):
    """Largest divisor of B <= batch_tile, capped so the grid has >=2 steps (v7x)."""
    cap = max(1, min(batch_tile, B))
    if B >= 2:
        cap = min(cap, (B + 1) // 2)
    for t in range(cap, 0, -1):
        if B % t == 0:
            return t
    return 1


def group_wise_spectral_embedding(x, weights, biases, num_groups, *, batch_tile=128):
    """x: (B, C, H, W); weights: (num_groups, Co, Cg, 1, K) torch layout; biases: (num_groups, Co)."""
    B, C, H, W = x.shape
    G = min(num_groups, C)
    Cg = C // G
    Co = weights.shape[1]
    K = weights.shape[-1]
    assert weights.shape[2] == Cg, "per-conv in_channels must equal C // num_groups"
    pad = K // 2
    W_out = W + 2 * pad - K + 1                    # == W (odd K), W + 1 (even K)
    L = H * W_out

    # ---- layout glue: reshape only (no transpose / pad HBM passes for odd K) ----
    if W_out == W:
        x_l = x.reshape(B, C, L)
    else:
        # even K: one extra zero column so input and output share the lane stride.
        # TODO(synk): even group_size pays one small input-pad pass; odd K is free.
        x_l = jnp.pad(x, ((0, 0), (0, 0), (0, 0), (0, W_out - W))).reshape(B, C, L)

    # ---- tiny weight preprocessing: per-lane weight rows with masks folded in ----
    w_t = weights[:G, :, :, 0, :].astype(jnp.float32)          # (G, Co, Cg, K)
    wpos = jnp.arange(W_out)[None, :]
    kpos = jnp.arange(K)[:, None]
    valid = ((wpos + kpos - pad >= 0) & (wpos + kpos - pad <= W - 1))
    mask_l = jnp.tile(valid.astype(jnp.float32), (1, H))        # (K, L), lane = h*W_out + w
    wrows = jnp.einsum('gock,kl->gckol', w_t, mask_l)           # (G, Cg, K, Co, L)
    wrows = wrows.reshape(G * Cg * K, Co, L)
    brows = biases[:G].astype(jnp.float32).reshape(G, Co, 1)

    Tb = _pick_batch_tile(B, batch_tile)
    kernel = functools.partial(_gwse_kernel, G=G, Cg=Cg, Co=Co, K=K, pad=pad, L=L)

    out = pl.pallas_call(
        kernel,
        out_shape=jax.ShapeDtypeStruct((B, G, Co, L), x.dtype),
        grid=(B // Tb,),
        in_specs=[
            pl.BlockSpec((Tb, C, L), lambda b: (b, 0, 0)),
            pl.BlockSpec((G * Cg * K, Co, L), lambda b: (0, 0, 0)),   # constant block
            pl.BlockSpec((G, Co, 1), lambda b: (0, 0, 0)),            # constant block
        ],
        out_specs=pl.BlockSpec((Tb, G, Co, L), lambda b: (b, 0, 0, 0)),
        compiler_params=pltpu.CompilerParams(
            dimension_semantics=("parallel",),
            vmem_limit_bytes=48 * 1024 * 1024,
        ),
    )(x_l, wrows, brows)

    # free reshape back to the torch output layout (B, G*Co, H, W_out)
    return out.reshape(B, G * Co, H, W_out)


def _reference(x, weights, biases, num_groups):
    """Exact f32 reference (explicit MACs, mirrors torch grouped Conv2d(1,K))."""
    B, C, H, W = x.shape
    G = min(num_groups, C)
    Cg = C // G
    Co = weights.shape[1]
    K = weights.shape[-1]
    pad = K // 2
    W_out = W + 2 * pad - K + 1
    xp = jnp.pad(x[:, :G * Cg].astype(jnp.float32),
                 ((0, 0), (0, 0), (0, 0), (pad, pad)))
    outs = []
    for g in range(G):
        chans = []
        for co in range(Co):
            s = jnp.zeros((B, H, W_out), jnp.float32)
            for cg in range(Cg):
                for k in range(K):
                    s = s + weights[g, co, cg, 0, k] * xp[:, g * Cg + cg, :, k:k + W_out]
            chans.append(s + biases[g, co])
        outs.append(jnp.stack(chans, axis=1))
    return jnp.concatenate(outs, axis=1).astype(x.dtype)


if __name__ == "__main__":
    # Module hyperparameters (consistent: in_channels of each conv == C // num_groups).
    num_groups = 4
    group_size = 3        # kernel width K (odd -> W_out == W)
    in_channels = 2       # == C // num_groups
    out_channels = 4

    B, C, H, W = 2, 8, 8, 16

    key = jax.random.PRNGKey(0)
    kx, kw, kb = jax.random.split(key, 3)

    x = jax.random.normal(kx, (B, C, H, W), dtype=jnp.float32)
    # torch Conv2d weight layout per group: (Co, Ci, 1, K), stacked over groups.
    weights = 0.1 * jax.random.normal(
        kw, (num_groups, out_channels, in_channels, 1, group_size), dtype=jnp.float32)
    biases = 0.1 * jax.random.normal(
        kb, (num_groups, out_channels), dtype=jnp.float32)

    out = group_wise_spectral_embedding(x, weights, biases, num_groups)
    out = jax.block_until_ready(out)

    ref = _reference(x, weights, biases, num_groups)
    assert out.shape == ref.shape, (out.shape, ref.shape)
    err = float(jnp.abs(out - ref).max())
    assert err < 1e-4, err

    print("KERNEL_OK")
</pallas_src>

<mosaic_0001>
module attributes {stable_mosaic.version = 11 : i64} {
  func.func @_gwse_kernel(%arg0: i32, %arg1: memref<1x8x128xf32, #tpu.memory_space<vmem>>, %arg2: memref<24x4x128xf32, #tpu.memory_space<vmem>>, %arg3: memref<4x4x1xf32, #tpu.memory_space<vmem>>, %arg4: memref<1x4x4x128xf32, #tpu.memory_space<vmem>>) attributes {dimension_semantics = [#tpu.dimension_semantics<parallel>], iteration_bounds = array<i64: 2>, scalar_prefetch = 0 : i64, scratch_operands = 0 : i64, tpu.core_type = #tpu.core_type<tc>, window_params = [{transform_indices = @transform_0, window_bounds = array<i64: 1, 8, 128>}, {pipeline_mode = #tpu.pipeline_mode<synchronous>, transform_indices = @transform_1, window_bounds = array<i64: 24, 4, 128>}, {pipeline_mode = #tpu.pipeline_mode<synchronous>, transform_indices = @transform_2, window_bounds = array<i64: 4, 4, 1>}, {transform_indices = @transform_3, window_bounds = array<i64: 1, 4, 4, 128>}]} {
    %c0 = arith.constant 0 : index
    %c0_0 = arith.constant 0 : index
    %c0_1 = arith.constant 0 : index
    %0 = vector.load %arg1[%c0, %c0_0, %c0_1] : memref<1x8x128xf32, #tpu.memory_space<vmem>>, vector<1x8x128xf32>
    %c1_i32 = arith.constant 1 : i32
    %1 = tpu.dynamic_rotate %0 by %c1_i32 dim 2 : vector<1x8x128xf32>, i32 -> vector<1x8x128xf32>
    %c127_i32 = arith.constant 127 : i32
    %2 = tpu.dynamic_rotate %0 by %c127_i32 dim 2 : vector<1x8x128xf32>, i32 -> vector<1x8x128xf32>
    %3 = vector.extract_strided_slice %1 {offsets = [0, 0, 0], sizes = [1, 1, 128], strides = [1, 1, 1]} : vector<1x8x128xf32> to vector<1x1x128xf32>
    %c0_2 = arith.constant 0 : index
    %c0_3 = arith.constant 0 : index
    %c0_4 = arith.constant 0 : index
    %4 = vector.load %arg2[%c0_2, %c0_3, %c0_4] : memref<24x4x128xf32, #tpu.memory_space<vmem>>, vector<1x4x128xf32>
    %5 = vector.shape_cast %4 : vector<1x4x128xf32> to vector<4x128xf32>
    %6 = vector.shape_cast %5 : vector<4x128xf32> to vector<1x4x128xf32>
    %7 = vector.broadcast %3 : vector<1x1x128xf32> to vector<1x4x128xf32>
    %8 = arith.mulf %6, %7 : vector<1x4x128xf32>
    %9 = vector.extract_strided_slice %0 {offsets = [0, 0, 0], sizes = [1, 1, 128], strides = [1, 1, 1]} : vector<1x8x128xf32> to vector<1x1x128xf32>
    %c1 = arith.constant 1 : index
    %c0_5 = arith.constant 0 : index
    %c0_6 = arith.constant 0 : index
    %10 = vector.load %arg2[%c1, %c0_5, %c0_6] : memref<24x4x128xf32, #tpu.memory_space<vmem>>, vector<1x4x128xf32>
    %11 = vector.shape_cast %10 : vector<1x4x128xf32> to vector<4x128xf32>
    %12 = vector.shape_cast %11 : vector<4x128xf32> to vector<1x4x128xf32>
    %13 = vector.broadcast %9 : vector<1x1x128xf32> to vector<1x4x128xf32>
    %14 = arith.mulf %12, %13 : vector<1x4x128xf32>
    %15 = arith.addf %8, %14 : vector<1x4x128xf32>
    %16 = vector.extract_strided_slice %2 {offsets = [0, 0, 0], sizes = [1, 1, 128], strides = [1, 1, 1]} : vector<1x8x128xf32> to vector<1x1x128xf32>
    %c2 = arith.constant 2 : index
    %c0_7 = arith.constant 0 : index
    %c0_8 = arith.constant 0 : index
    %17 = vector.load %arg2[%c2, %c0_7, %c0_8] : memref<24x4x128xf32, #tpu.memory_space<vmem>>, vector<1x4x128xf32>
    %18 = vector.shape_cast %17 : vector<1x4x128xf32> to vector<4x128xf32>
    %19 = vector.shape_cast %18 : vector<4x128xf32> to vector<1x4x128xf32>
    %20 = vector.broadcast %16 : vector<1x1x128xf32> to vector<1x4x128xf32>
    %21 = arith.mulf %19, %20 : vector<1x4x128xf32>
    %22 = arith.addf %15, %21 : vector<1x4x128xf32>
    %23 = vector.extract_strided_slice %1 {offsets = [0, 1, 0], sizes = [1, 1, 128], strides = [1, 1, 1]} : vector<1x8x128xf32> to vector<1x1x128xf32>
    %c3 = arith.constant 3 : index
    %c0_9 = arith.constant 0 : index
    %c0_10 = arith.constant 0 : index
    %24 = vector.load %arg2[%c3, %c0_9, %c0_10] : memref<24x4x128xf32, #tpu.memory_space<vmem>>, vector<1x4x128xf32>
    %25 = vector.shape_cast %24 : vector<1x4x128xf32> to vector<4x128xf32>
    %26 = vector.shape_cast %25 : vector<4x128xf32> to vector<1x4x128xf32>
    %27 = vector.broadcast %23 : vector<1x1x128xf32> to vector<1x4x128xf32>
    %28 = arith.mulf %26, %27 : vector<1x4x128xf32>
    %29 = arith.addf %22, %28 : vector<1x4x128xf32>
    %30 = vector.extract_strided_slice %0 {offsets = [0, 1, 0], sizes = [1, 1, 128], strides = [1, 1, 1]} : vector<1x8x128xf32> to vector<1x1x128xf32>
    %c4 = arith.constant 4 : index
    %c0_11 = arith.constant 0 : index
    %c0_12 = arith.constant 0 : index
    %31 = vector.load %arg2[%c4, %c0_11, %c0_12] : memref<24x4x128xf32, #tpu.memory_space<vmem>>, vector<1x4x128xf32>
    %32 = vector.shape_cast %31 : vector<1x4x128xf32> to vector<4x128xf32>
    %33 = vector.shape_cast %32 : vector<4x128xf32> to vector<1x4x128xf32>
    %34 = vector.broadcast %30 : vector<1x1x128xf32> to vector<1x4x128xf32>
    %35 = arith.mulf %33, %34 : vector<1x4x128xf32>
    %36 = arith.addf %29, %35 : vector<1x4x128xf32>
    %37 = vector.extract_strided_slice %2 {offsets = [0, 1, 0], sizes = [1, 1, 128], strides = [1, 1, 1]} : vector<1x8x128xf32> to vector<1x1x128xf32>
    %c5 = arith.constant 5 : index
    %c0_13 = arith.constant 0 : index
    %c0_14 = arith.constant 0 : index
    %38 = vector.load %arg2[%c5, %c0_13, %c0_14] : memref<24x4x128xf32, #tpu.memory_space<vmem>>, vector<1x4x128xf32>
    %39 = vector.shape_cast %38 : vector<1x4x128xf32> to vector<4x128xf32>
    %40 = vector.shape_cast %39 : vector<4x128xf32> to vector<1x4x128xf32>
    %41 = vector.broadcast %37 : vector<1x1x128xf32> to vector<1x4x128xf32>
    %42 = arith.mulf %40, %41 : vector<1x4x128xf32>
    %43 = arith.addf %36, %42 : vector<1x4x128xf32>
    %c0_15 = arith.constant 0 : index
    %c0_16 = arith.constant 0 : index
    %c0_17 = arith.constant 0 : index
    %44 = vector.load %arg3[%c0_15, %c0_16, %c0_17] : memref<4x4x1xf32, #tpu.memory_space<vmem>>, vector<1x4x1xf32>
    %45 = vector.shape_cast %44 : vector<1x4x1xf32> to vector<4x1xf32>
    %46 = vector.shape_cast %45 : vector<4x1xf32> to vector<1x4x1xf32>
    %47 = vector.broadcast %46 : vector<1x4x1xf32> to vector<1x4x128xf32>
    %48 = arith.addf %43, %47 : vector<1x4x128xf32>
    %c0_18 = arith.constant 0 : index
    %c0_19 = arith.constant 0 : index
    %c0_20 = arith.constant 0 : index
    %c0_21 = arith.constant 0 : index
    %49 = vector.load %arg4[%c0_18, %c0_19, %c0_20, %c0_21] : memref<1x4x4x128xf32, #tpu.memory_space<vmem>>, vector<1x1x4x128xf32>
    %50 = vector.shape_cast %49 : vector<1x1x4x128xf32> to vector<1x4x128xf32>
    %51 = vector.shape_cast %48 : vector<1x4x128xf32> to vector<1x1x4x128xf32>
    tpu.vector_store %arg4[%c0_18, %c0_19, %c0_20, %c0_21], %51 {strides = array<i32>} : memref<1x4x4x128xf32, #tpu.memory_space<vmem>>, vector<1x1x4x128xf32>,
    %52 = vector.extract_strided_slice %1 {offsets = [0, 2, 0], sizes = [1, 1, 128], strides = [1, 1, 1]} : vector<1x8x128xf32> to vector<1x1x128xf32>
    %c6 = arith.constant 6 : index
    %c0_22 = arith.constant 0 : index
    %c0_23 = arith.constant 0 : index
    %53 = vector.load %arg2[%c6, %c0_22, %c0_23] : memref<24x4x128xf32, #tpu.memory_space<vmem>>, vector<1x4x128xf32>
    %54 = vector.shape_cast %53 : vector<1x4x128xf32> to vector<4x128xf32>
    %55 = vector.shape_cast %54 : vector<4x128xf32> to vector<1x4x128xf32>
    %56 = vector.broadcast %52 : vector<1x1x128xf32> to vector<1x4x128xf32>
    %57 = arith.mulf %55, %56 : vector<1x4x128xf32>
    %58 = vector.extract_strided_slice %0 {offsets = [0, 2, 0], sizes = [1, 1, 128], strides = [1, 1, 1]} : vector<1x8x128xf32> to vector<1x1x128xf32>
    %c7 = arith.constant 7 : index
    %c0_24 = arith.constant 0 : index
    %c0_25 = arith.constant 0 : index
    %59 = vector.load %arg2[%c7, %c0_24, %c0_25] : memref<24x4x128xf32, #tpu.memory_space<vmem>>, vector<1x4x128xf32>
    %60 = vector.shape_cast %59 : vector<1x4x128xf32> to vector<4x128xf32>
    %61 = vector.shape_cast %60 : vector<4x128xf32> to vector<1x4x128xf32>
    %62 = vector.broadcast %58 : vector<1x1x128xf32> to vector<1x4x128xf32>
    %63 = arith.mulf %61, %62 : vector<1x4x128xf32>
    %64 = arith.addf %57, %63 : vector<1x4x128xf32>
    %65 = vector.extract_strided_slice %2 {offsets = [0, 2, 0], sizes = [1, 1, 128], strides = [1, 1, 1]} : vector<1x8x128xf32> to vector<1x1x128xf32>
    %c8 = arith.constant 8 : index
    %c0_26 = arith.constant 0 : index
    %c0_27 = arith.constant 0 : index
    %66 = vector.load %arg2[%c8, %c0_26, %c0_27] : memref<24x4x128xf32, #tpu.memory_space<vmem>>, vector<1x4x128xf32>
    %67 = vector.shape_cast %66 : vector<1x4x128xf32> to vector<4x128xf32>
    %68 = vector.shape_cast %67 : vector<4x128xf32> to vector<1x4x128xf32>
    %69 = vector.broadcast %65 : vector<1x1x128xf32> to vector<1x4x128xf32>
    %70 = arith.mulf %68, %69 : vector<1x4x128xf32>
    %71 = arith.addf %64, %70 : vector<1x4x128xf32>
    %72 = vector.extract_strided_slice %1 {offsets = [0, 3, 0], sizes = [1, 1, 128], strides = [1, 1, 1]} : vector<1x8x128xf32> to vector<1x1x128xf32>
    %c9 = arith.constant 9 : index
    %c0_28 = arith.constant 0 : index
    %c0_29 = arith.constant 0 : index
    %73 = vector.load %arg2[%c9, %c0_28, %c0_29] : memref<24x4x128xf32, #tpu.memory_space<vmem>>, vector<1x4x128xf32>
    %74 = vector.shape_cast %73 : vector<1x4x128xf32> to vector<4x128xf32>
    %75 = vector.shape_cast %74 : vector<4x128xf32> to vector<1x4x128xf32>
    %76 = vector.broadcast %72 : vector<1x1x128xf32> to vector<1x4x128xf32>
    %77 = arith.mulf %75, %76 : vector<1x4x128xf32>
    %78 = arith.addf %71, %77 : vector<1x4x128xf32>
    %79 = vector.extract_strided_slice %0 {offsets = [0, 3, 0], sizes = [1, 1, 128], strides = [1, 1, 1]} : vector<1x8x128xf32> to vector<1x1x128xf32>
    %c10 = arith.constant 10 : index
    %c0_30 = arith.constant 0 : index
    %c0_31 = arith.constant 0 : index
    %80 = vector.load %arg2[%c10, %c0_30, %c0_31] : memref<24x4x128xf32, #tpu.memory_space<vmem>>, vector<1x4x128xf32>
    %81 = vector.shape_cast %80 : vector<1x4x128xf32> to vector<4x128xf32>
    %82 = vector.shape_cast %81 : vector<4x128xf32> to vector<1x4x128xf32>
    %83 = vector.broadcast %79 : vector<1x1x128xf32> to vector<1x4x128xf32>
    %84 = arith.mulf %82, %83 : vector<1x4x128xf32>
    %85 = arith.addf %78, %84 : vector<1x4x128xf32>
    %86 = vector.extract_strided_slice %2 {offsets = [0, 3, 0], sizes = [1, 1, 128], strides = [1, 1, 1]} : vector<1x8x128xf32> to vector<1x1x128xf32>
    %c11 = arith.constant 11 : index
    %c0_32 = arith.constant 0 : index
    %c0_33 = arith.constant 0 : index
    %87 = vector.load %arg2[%c11, %c0_32, %c0_33] : memref<24x4x128xf32, #tpu.memory_space<vmem>>, vector<1x4x128xf32>
    %88 = vector.shape_cast %87 : vector<1x4x128xf32> to vector<4x128xf32>
    %89 = vector.shape_cast %88 : vector<4x128xf32> to vector<1x4x128xf32>
    %90 = vector.broadcast %86 : vector<1x1x128xf32> to vector<1x4x128xf32>
    %91 = arith.mulf %89, %90 : vector<1x4x128xf32>
    %92 = arith.addf %85, %91 : vector<1x4x128xf32>
    %c1_34 = arith.constant 1 : index
    %c0_35 = arith.constant 0 : index
    %c0_36 = arith.constant 0 : index
    %93 = vector.load %arg3[%c1_34, %c0_35, %c0_36] : memref<4x4x1xf32, #tpu.memory_space<vmem>>, vector<1x4x1xf32>
    %94 = vector.shape_cast %93 : vector<1x4x1xf32> to vector<4x1xf32>
    %95 = vector.shape_cast %94 : vector<4x1xf32> to vector<1x4x1xf32>
    %96 = vector.broadcast %95 : vector<1x4x1xf32> to vector<1x4x128xf32>
    %97 = arith.addf %92, %96 : vector<1x4x128xf32>
    %c0_37 = arith.constant 0 : index
    %c1_38 = arith.constant 1 : index
    %c0_39 = arith.constant 0 : index
    %c0_40 = arith.constant 0 : index
    %98 = vector.load %arg4[%c0_37, %c1_38, %c0_39, %c0_40] : memref<1x4x4x128xf32, #tpu.memory_space<vmem>>, vector<1x1x4x128xf32>
    %99 = vector.shape_cast %98 : vector<1x1x4x128xf32> to vector<1x4x128xf32>
    %100 = vector.shape_cast %97 : vector<1x4x128xf32> to vector<1x1x4x128xf32>
    tpu.vector_store %arg4[%c0_37, %c1_38, %c0_39, %c0_40], %100 {strides = array<i32>} : memref<1x4x4x128xf32, #tpu.memory_space<vmem>>, vector<1x1x4x128xf32>,
    %101 = vector.extract_strided_slice %1 {offsets = [0, 4, 0], sizes = [1, 1, 128], strides = [1, 1, 1]} : vector<1x8x128xf32> to vector<1x1x128xf32>
    %c12 = arith.constant 12 : index
    %c0_41 = arith.constant 0 : index
    %c0_42 = arith.constant 0 : index
    %102 = vector.load %arg2[%c12, %c0_41, %c0_42] : memref<24x4x128xf32, #tpu.memory_space<vmem>>, vector<1x4x128xf32>
    %103 = vector.shape_cast %102 : vector<1x4x128xf32> to vector<4x128xf32>
    %104 = vector.shape_cast %103 : vector<4x128xf32> to vector<1x4x128xf32>
    %105 = vector.broadcast %101 : vector<1x1x128xf32> to vector<1x4x128xf32>
    %106 = arith.mulf %104, %105 : vector<1x4x128xf32>
    %107 = vector.extract_strided_slice %0 {offsets = [0, 4, 0], sizes = [1, 1, 128], strides = [1, 1, 1]} : vector<1x8x128xf32> to vector<1x1x128xf32>
    %c13 = arith.constant 13 : index
    %c0_43 = arith.constant 0 : index
    %c0_44 = arith.constant 0 : index
    %108 = vector.load %arg2[%c13, %c0_43, %c0_44] : memref<24x4x128xf32, #tpu.memory_space<vmem>>, vector<1x4x128xf32>
    %109 = vector.shape_cast %108 : vector<1x4x128xf32> to vector<4x128xf32>
    %110 = vector.shape_cast %109 : vector<4x128xf32> to vector<1x4x128xf32>
    %111 = vector.broadcast %107 : vector<1x1x128xf32> to vector<1x4x128xf32>
    %112 = arith.mulf %110, %111 : vector<1x4x128xf32>
    %113 = arith.addf %106, %112 : vector<1x4x128xf32>
    %114 = vector.extract_strided_slice %2 {offsets = [0, 4, 0], sizes = [1, 1, 128], strides = [1, 1, 1]} : vector<1x8x128xf32> to vector<1x1x128xf32>
    %c14 = arith.constant 14 : index
    %c0_45 = arith.constant 0 : index
    %c0_46 = arith.constant 0 : index
    %115 = vector.load %arg2[%c14, %c0_45, %c0_46] : memref<24x4x128xf32, #tpu.memory_space<vmem>>, vector<1x4x128xf32>
    %116 = vector.shape_cast %115 : vector<1x4x128xf32> to vector<4x128xf32>
    %117 = vector.shape_cast %116 : vector<4x128xf32> to vector<1x4x128xf32>
    %118 = vector.broadcast %114 : vector<1x1x128xf32> to vector<1x4x128xf32>
    %119 = arith.mulf %117, %118 : vector<1x4x128xf32>
    %120 = arith.addf %113, %119 : vector<1x4x128xf32>
    %121 = vector.extract_strided_slice %1 {offsets = [0, 5, 0], sizes = [1, 1, 128], strides = [1, 1, 1]} : vector<1x8x128xf32> to vector<1x1x128xf32>
    %c15 = arith.constant 15 : index
    %c0_47 = arith.constant 0 : index
    %c0_48 = arith.constant 0 : index
    %122 = vector.load %arg2[%c15, %c0_47, %c0_48] : memref<24x4x128xf32, #tpu.memory_space<vmem>>, vector<1x4x128xf32>
    %123 = vector.shape_cast %122 : vector<1x4x128xf32> to vector<4x128xf32>
    %124 = vector.shape_cast %123 : vector<4x128xf32> to vector<1x4x128xf32>
    %125 = vector.broadcast %121 : vector<1x1x128xf32> to vector<1x4x128xf32>
    %126 = arith.mulf %124, %125 : vector<1x4x128xf32>
    %127 = arith.addf %120, %126 : vector<1x4x128xf32>
    %128 = vector.extract_strided_slice %0 {offsets = [0, 5, 0], sizes = [1, 1, 128], strides = [1, 1, 1]} : vector<1x8x128xf32> to vector<1x1x128xf32>
    %c16 = arith.constant 16 : index
    %c0_49 = arith.constant 0 : index
    %c0_50 = arith.constant 0 : index
    %129 = vector.load %arg2[%c16, %c0_49, %c0_50] : memref<24x4x128xf32, #tpu.memory_space<vmem>>, vector<1x4x128xf32>
    %130 = vector.shape_cast %129 : vector<1x4x128xf32> to vector<4x128xf32>
    %131 = vector.shape_cast %130 : vector<4x128xf32> to vector<1x4x128xf32>
    %132 = vector.broadcast %128 : vector<1x1x128xf32> to vector<1x4x128xf32>
    %133 = arith.mulf %131, %132 : vector<1x4x128xf32>
    %134 = arith.addf %127, %133 : vector<1x4x128xf32>
    %135 = vector.extract_strided_slice %2 {offsets = [0, 5, 0], sizes = [1, 1, 128], strides = [1, 1, 1]} : vector<1x8x128xf32> to vector<1x1x128xf32>
    %c17 = arith.constant 17 : index
    %c0_51 = arith.constant 0 : index
    %c0_52 = arith.constant 0 : index
    %136 = vector.load %arg2[%c17, %c0_51, %c0_52] : memref<24x4x128xf32, #tpu.memory_space<vmem>>, vector<1x4x128xf32>
    %137 = vector.shape_cast %136 : vector<1x4x128xf32> to vector<4x128xf32>
    %138 = vector.shape_cast %137 : vector<4x128xf32> to vector<1x4x128xf32>
    %139 = vector.broadcast %135 : vector<1x1x128xf32> to vector<1x4x128xf32>
    %140 = arith.mulf %138, %139 : vector<1x4x128xf32>
    %141 = arith.addf %134, %140 : vector<1x4x128xf32>
    %c2_53 = arith.constant 2 : index
    %c0_54 = arith.constant 0 : index
    %c0_55 = arith.constant 0 : index
    %142 = vector.load %arg3[%c2_53, %c0_54, %c0_55] : memref<4x4x1xf32, #tpu.memory_space<vmem>>, vector<1x4x1xf32>
    %143 = vector.shape_cast %142 : vector<1x4x1xf32> to vector<4x1xf32>
    %144 = vector.shape_cast %143 : vector<4x1xf32> to vector<1x4x1xf32>
    %145 = vector.broadcast %144 : vector<1x4x1xf32> to vector<1x4x128xf32>
    %146 = arith.addf %141, %145 : vector<1x4x128xf32>
    %c0_56 = arith.constant 0 : index
    %c2_57 = arith.constant 2 : index
    %c0_58 = arith.constant 0 : index
    %c0_59 = arith.constant 0 : index
    %147 = vector.load %arg4[%c0_56, %c2_57, %c0_58, %c0_59] : memref<1x4x4x128xf32, #tpu.memory_space<vmem>>, vector<1x1x4x128xf32>
    %148 = vector.shape_cast %147 : vector<1x1x4x128xf32> to vector<1x4x128xf32>
    %149 = vector.shape_cast %146 : vector<1x4x128xf32> to vector<1x1x4x128xf32>
    tpu.vector_store %arg4[%c0_56, %c2_57, %c0_58, %c0_59], %149 {strides = array<i32>} : memref<1x4x4x128xf32, #tpu.memory_space<vmem>>, vector<1x1x4x128xf32>,
    %150 = vector.extract_strided_slice %1 {offsets = [0, 6, 0], sizes = [1, 1, 128], strides = [1, 1, 1]} : vector<1x8x128xf32> to vector<1x1x128xf32>
    %c18 = arith.constant 18 : index
    %c0_60 = arith.constant 0 : index
    %c0_61 = arith.constant 0 : index
    %151 = vector.load %arg2[%c18, %c0_60, %c0_61] : memref<24x4x128xf32, #tpu.memory_space<vmem>>, vector<1x4x128xf32>
    %152 = vector.shape_cast %151 : vector<1x4x128xf32> to vector<4x128xf32>
    %153 = vector.shape_cast %152 : vector<4x128xf32> to vector<1x4x128xf32>
    %154 = vector.broadcast %150 : vector<1x1x128xf32> to vector<1x4x128xf32>
    %155 = arith.mulf %153, %154 : vector<1x4x128xf32>
    %156 = vector.extract_strided_slice %0 {offsets = [0, 6, 0], sizes = [1, 1, 128], strides = [1, 1, 1]} : vector<1x8x128xf32> to vector<1x1x128xf32>
    %c19 = arith.constant 19 : index
    %c0_62 = arith.constant 0 : index
    %c0_63 = arith.constant 0 : index
    %157 = vector.load %arg2[%c19, %c0_62, %c0_63] : memref<24x4x128xf32, #tpu.memory_space<vmem>>, vector<1x4x128xf32>
    %158 = vector.shape_cast %157 : vector<1x4x128xf32> to vector<4x128xf32>
    %159 = vector.shape_cast %158 : vector<4x128xf32> to vector<1x4x128xf32>
    %160 = vector.broadcast %156 : vector<1x1x128xf32> to vector<1x4x128xf32>
    %161 = arith.mulf %159, %160 : vector<1x4x128xf32>
    %162 = arith.addf %155, %161 : vector<1x4x128xf32>
    %163 = vector.extract_strided_slice %2 {offsets = [0, 6, 0], sizes = [1, 1, 128], strides = [1, 1, 1]} : vector<1x8x128xf32> to vector<1x1x128xf32>
    %c20 = arith.constant 20 : index
    %c0_64 = arith.constant 0 : index
    %c0_65 = arith.constant 0 : index
    %164 = vector.load %arg2[%c20, %c0_64, %c0_65] : memref<24x4x128xf32, #tpu.memory_space<vmem>>, vector<1x4x128xf32>
    %165 = vector.shape_cast %164 : vector<1x4x128xf32> to vector<4x128xf32>
    %166 = vector.shape_cast %165 : vector<4x128xf32> to vector<1x4x128xf32>
    %167 = vector.broadcast %163 : vector<1x1x128xf32> to vector<1x4x128xf32>
    %168 = arith.mulf %166, %167 : vector<1x4x128xf32>
    %169 = arith.addf %162, %168 : vector<1x4x128xf32>
    %170 = vector.extract_strided_slice %1 {offsets = [0, 7, 0], sizes = [1, 1, 128], strides = [1, 1, 1]} : vector<1x8x128xf32> to vector<1x1x128xf32>
    %c21 = arith.constant 21 : index
    %c0_66 = arith.constant 0 : index
    %c0_67 = arith.constant 0 : index
    %171 = vector.load %arg2[%c21, %c0_66, %c0_67] : memref<24x4x128xf32, #tpu.memory_space<vmem>>, vector<1x4x128xf32>
    %172 = vector.shape_cast %171 : vector<1x4x128xf32> to vector<4x128xf32>
    %173 = vector.shape_cast %172 : vector<4x128xf32> to vector<1x4x128xf32>
    %174 = vector.broadcast %170 : vector<1x1x128xf32> to vector<1x4x128xf32>
    %175 = arith.mulf %173, %174 : vector<1x4x128xf32>
    %176 = arith.addf %169, %175 : vector<1x4x128xf32>
    %177 = vector.extract_strided_slice %0 {offsets = [0, 7, 0], sizes = [1, 1, 128], strides = [1, 1, 1]} : vector<1x8x128xf32> to vector<1x1x128xf32>
    %c22 = arith.constant 22 : index
    %c0_68 = arith.constant 0 : index
    %c0_69 = arith.constant 0 : index
    %178 = vector.load %arg2[%c22, %c0_68, %c0_69] : memref<24x4x128xf32, #tpu.memory_space<vmem>>, vector<1x4x128xf32>
    %179 = vector.shape_cast %178 : vector<1x4x128xf32> to vector<4x128xf32>
    %180 = vector.shape_cast %179 : vector<4x128xf32> to vector<1x4x128xf32>
    %181 = vector.broadcast %177 : vector<1x1x128xf32> to vector<1x4x128xf32>
    %182 = arith.mulf %180, %181 : vector<1x4x128xf32>
    %183 = arith.addf %176, %182 : vector<1x4x128xf32>
    %184 = vector.extract_strided_slice %2 {offsets = [0, 7, 0], sizes = [1, 1, 128], strides = [1, 1, 1]} : vector<1x8x128xf32> to vector<1x1x128xf32>
    %c23 = arith.constant 23 : index
    %c0_70 = arith.constant 0 : index
    %c0_71 = arith.constant 0 : index
    %185 = vector.load %arg2[%c23, %c0_70, %c0_71] : memref<24x4x128xf32, #tpu.memory_space<vmem>>, vector<1x4x128xf32>
    %186 = vector.shape_cast %185 : vector<1x4x128xf32> to vector<4x128xf32>
    %187 = vector.shape_cast %186 : vector<4x128xf32> to vector<1x4x128xf32>
    %188 = vector.broadcast %184 : vector<1x1x128xf32> to vector<1x4x128xf32>
    %189 = arith.mulf %187, %188 : vector<1x4x128xf32>
    %190 = arith.addf %183, %189 : vector<1x4x128xf32>
    %c3_72 = arith.constant 3 : index
    %c0_73 = arith.constant 0 : index
    %c0_74 = arith.constant 0 : index
    %191 = vector.load %arg3[%c3_72, %c0_73, %c0_74] : memref<4x4x1xf32, #tpu.memory_space<vmem>>, vector<1x4x1xf32>
    %192 = vector.shape_cast %191 : vector<1x4x1xf32> to vector<4x1xf32>
    %193 = vector.shape_cast %192 : vector<4x1xf32> to vector<1x4x1xf32>
    %194 = vector.broadcast %193 : vector<1x4x1xf32> to vector<1x4x128xf32>
    %195 = arith.addf %190, %194 : vector<1x4x128xf32>
    %c0_75 = arith.constant 0 : index
    %c3_76 = arith.constant 3 : index
    %c0_77 = arith.constant 0 : index
    %c0_78 = arith.constant 0 : index
    %196 = vector.load %arg4[%c0_75, %c3_76, %c0_77, %c0_78] : memref<1x4x4x128xf32, #tpu.memory_space<vmem>>, vector<1x1x4x128xf32>
    %197 = vector.shape_cast %196 : vector<1x1x4x128xf32> to vector<1x4x128xf32>
    %198 = vector.shape_cast %195 : vector<1x4x128xf32> to vector<1x1x4x128xf32>
    tpu.vector_store %arg4[%c0_75, %c3_76, %c0_77, %c0_78], %198 {strides = array<i32>} : memref<1x4x4x128xf32, #tpu.memory_space<vmem>>, vector<1x1x4x128xf32>,
    return
  }
  func.func @transform_0(%arg0: i32) -> (i32, i32, i32) {
    %c0_i32 = arith.constant 0 : i32
    %c0_i32_0 = arith.constant 0 : i32
    %c0_i32_1 = arith.constant 0 : i32
    return %arg0, %c0_i32, %c0_i32_0 : i32, i32, i32
  }
  func.func @transform_1(%arg0: i32) -> (i32, i32, i32) {
    %c0_i32 = arith.constant 0 : i32
    %c0_i32_0 = arith.constant 0 : i32
    %c0_i32_1 = arith.constant 0 : i32
    %c0_i32_2 = arith.constant 0 : i32
    return %c0_i32, %c0_i32_0, %c0_i32_1 : i32, i32, i32
  }
  func.func @transform_2(%arg0: i32) -> (i32, i32, i32) {
    %c0_i32 = arith.constant 0 : i32
    %c0_i32_0 = arith.constant 0 : i32
    %c0_i32_1 = arith.constant 0 : i32
    %c0_i32_2 = arith.constant 0 : i32
    return %c0_i32, %c0_i32_0, %c0_i32_1 : i32, i32, i32
  }
  func.func @transform_3(%arg0: i32) -> (i32, i32, i32, i32) {
    %c0_i32 = arith.constant 0 : i32
    %c0_i32_0 = arith.constant 0 : i32
    %c0_i32_1 = arith.constant 0 : i32
    %c0_i32_2 = arith.constant 0 : i32
    return %arg0, %c0_i32, %c0_i32_0, %c0_i32_1 : i32, i32, i32, i32
  }
}

</mosaic_0001>

<bundles_post_ra>
// kernel: tpu_custom_call.1
= control target key start
LH: loop header
LB: loop body
LE: loop exit
PB: predicated region body
PF: predicated region fallthrough
CT: control target
= control target key end

     0   :  { %8 = vsyncpa [#allocation3], 0  ;;  %s922_s0 = inlined_call_operand.vmem [shape: f32[2,8,128], index: 0, kind: input, shape index: {}]   ;;  %s923_s1 = inlined_call_operand.hbm [shape: f32[24,4,128], index: 1, kind: input, shape index: {}]   ;;  %s924_s2 = inlined_call_operand.vmem [shape: f32[4,4,1], index: 2, kind: input, shape index: {}]   ;;  %s925_s3 = inlined_call_operand.hbm [shape: f32[2,4,4,128], index: 3, kind: output, shape index: {}]  }
   0x1   :  { %9 = vsyncpa [#allocation4], 0 }
   0x2   :  { %11 = vsyncpa [#allocation4 + $0x1], 0  ;;  %s703_s12 = smov 0   ;;  %s705_s13 = smov 0  }
   0x3   :  { %s707_s14 = smov 0   ;;  %s709_s15 = smov 0  }
   0x4 LB: > { %s724_s16 = sadd.s32 4294967295, %s672_s15   ;;  %s499_s17 = sadd.s32 4294967294, %s672_s15   ;;  %s672_s15 = sphi %s709_s15, %s941_s15   ;;  %s668_s14 = sphi %s707_s14, %s940_s14   ;;  %s664_s13 = sphi %s705_s13, %s939_s13   ;;  %s660_s12 = sphi %s703_s12, %s938_s12  }
   0x5   : > { %s728_s18 = sadd.s32 1, %s672_s15   ;;  %s92_s19 = sadd.s32 1, %s668_s14 }
   0x6   : > { %s89_s20 = ssub.s32 %s672_s15, %s728_s18  ;;  %p102_p0 = scmp.ne.s32.totalorder %s668_s14, %s664_s13 }
   0x7   : > { %p90_p1 = scmp.eq.s32.totalorder %s89_s20, 0  ;;  %p103_p2 = scmp.eq.s32.totalorder %s724_s16, 1 }
   0x8   : > { %p108_p3 = scmp.ne.s32.totalorder %s664_s13, %s660_s12  ;;  %p109_p4 = scmp.eq.s32.totalorder %s499_s17, 1 }
   0x9   : > { %s739_s21 = scalar_select %p90_p1, %s668_s14, %s92_s19  }
   0xa   : > { %p741_p5 = por %p103_p2, %p102_p0  ;;  %p745_p6 = por %p109_p4, %p108_p3 }
   0xb   : > { %p500_p7 = scmp.ge.s32.totalorder %s672_s15, 1  ;;  %p116_p8 = scmp.lt.s32.totalorder %s672_s15, 3 }
   0xc   : > { %s929_s22 = scalar_select %p741_p5, 1, 0 }
   0xd   : > { %s930_s23 = scalar_select %p745_p6, 1, 0 }
   0xe   : > { %p926_p9 = scmp.eq.s32.totalorder %s724_s16, 0  ;;  %p752_p10 = pnand %p500_p7, %p116_p8 }
   0xf   : > { %s674_s25 = smov [#allocation2]   ;;  %s578_s30 = scalar_lea.hbm %s923_s1, 1536 }
  0x10   : > { %s931_s24 = scalar_select %p752_p10, 1, 0 }
  0x11   : > { %s128_s26 = sshll.u32 %s674_s25, 4  ;;  %p525_p11 = pneg %p752_p10  ;;  %s129_s26 = int_to_ptr.vmem [resolvable:$true] %s128_s26 }
  0x12   : > { %p579_p13 = scmp.ne.s32.totalorder %s923_s1, %s578_s30  ;;  %p585_p3 = scmp.lt.u32.totalorder %s578_s30, %s923_s1 }
  0x13   : > { %p760_p12 = pnand %p926_p9, %p525_p11 }
  0x15   : > { %p580_p0 = pneg %p760_p12 }
  0x17   : > { %p581_p1 = pnand %p580_p0, %p579_p13 }
  0x19   : > { %p582_p2 = pneg %p581_p1 }
  0x1b   : > { %p587_p4 = pnand %p585_p3, %p582_p2 }
  0x1d   : > { %590 = shalt.err (!%p587_p4)
}
  0x1e   : > { %s591_s8 = scalar_lea.vmem %s129_s26, 1536  ;;  %p599_p9 = scmp.lt.s32.totalorder %s129_s26, %s129_s26 }
  0x1f   : > { %p592_p7 = scmp.ne.s32.totalorder %s129_s26, %s591_s8  ;;  %p600_p6 = scmp.lt.s32.totalorder %s591_s8, %s591_s8 }
  0x21   : > { %p594_p8 = pnand %p592_p7, %p580_p0  ;;  %p601_p5 = por %p600_p6, %p599_p9 }
  0x23   : > { %p595_p11 = pneg %p594_p8 }
  0x25   : > { %p602_p10 = pnand %p601_p5, %p595_p11 }
  0x27   : > { %605 = shalt.err (!%p602_p10)
}
  0x28   : > { %s675_s9 = smov 64   ;;  %s676_s10 = smov 4  }
  0x29   : > { %528 = dma.hbm_to_vmem [thread:$0]  (!%p760_p12), %s923_s1, 1536, %s129_s26, [#allocation3], %s675_s9, %s675_s9, %s676_s10  }
  0x2a   : > { %p933_p13 = scmp.ne.s32.totalorder %s931_s24, 0 }
  0x2b   : > { %p934_p1 = scmp.eq.s32.totalorder (!%p933_p13), %s724_s16, 0 }
  0x2c   : > { %154 = sbr.rel (%p933_p13) target bundleno = 212 (0xd4), region = 32 }
  0x33   : > { %651 = dma.done.wait (%p934_p1), [#allocation3], 1536   ;;  %p935_p0 = pmov %p934_p1 }
  0x34   : > { %p177_p5 = scmp.lt.s32.totalorder %s724_s16, 1  ;;  %v677_v0 = vmov 0   ;;  %v232_v1 = vld [vmem:[%s924_s2] sm:$0xf]  ;;  %s678_s29 = smov 1   ;;  %v187_v6 = vlaneseq }
  0x35   : > { %653 = vsyncadd (%p935_p0), [#allocation3], 4294965760  ;;  %576 = vset.pattern.permute.xlu1 %v677_v0  ;;  %577 = vset.pattern.permute.xlu0 %v677_v0  ;;  %v507_v3 = vld [vmem:[%s924_s2 + $0x4] sm:$0xf]  ;;  %s679_s5 = smov 127   ;;  %s174_s10 = sand.u32 1, %s664_s13  }
  0x36   : > { %s178_s19 = scalar_select %p177_p5, %s724_s16, 1  ;;  %235 = vperm.xlu1 %576, %v232_v1   ;;  %v511_v4 = vld [vmem:[%s924_s2 + $0xc] sm:$0xf]  ;;  %v509_v5 = vld [vmem:[%s924_s2 + $0x8] sm:$0xf]  ;;  %v188_v7 = vshrl.u32 %v187_v6, 7 }
  0x37   : > { %v193_v14 = vld [vmem:[#allocation2 + $0x4] sm:$0xf]  ;;  %v186_v17 = vld [vmem:[#allocation2] sm:$0xf]  ;;  %v217_v22 = vld [vmem:[#allocation2 + $0x10] sm:$0xf] }
  0x38   : > { %s506_s20 = sshll.u32 %s178_s19, 3  ;;  %v189_v8 = vsub.s32 0, %v188_v7  ;;  %v244_v9 = vsub.s32 2, %v188_v7  ;;  %v807_v10 = vsub.s32 6, %v188_v7  ;;  %v809_v11 = vsub.s32 1, %v188_v7  ;;  %s505_s11 = sshll.u32 %s174_s10, 4 }
  0x39   : > { %s180_s26 = scalar_lea.vmem %s922_s0, %s506_s20  ;;  %v812_v13 = vsub.s32 4, %v188_v7  ;;  %v814_v15 = vsub.s32 3, %v188_v7  ;;  %v816_v16 = vsub.s32 7, %v188_v7  ;;  %v821_v20 = vsub.s32 5, %v188_v7  ;;  %v241_v23 = vld [vmem:[#allocation2 + $0x18] sm:$0xf] }
  0x3a   : > { %v794_v2 = vld [vmem:[%s180_s26] sm:$0xff]  ;;  %291 = vperm.xlu1 %576, %v507_v3   ;;  %v248_v24 = vld [vmem:[#allocation2 + $0x1c] sm:$0xf]  ;;  %v272_v30 = vld [vmem:[#allocation2 + $0x28] sm:$0xf]  ;;  %s176_s17 = scalar_lea.vmem [#allocation5], %s505_s11 }
  0x3b   : > { %182 = vrot.lane.b32.xlu0 %v794_v2, %s678_s29  ;;  %v197_v12 = vrot.slane %v794_v2, %v189_v8  ;;  %v221_v18 = vrot.slane %v794_v2, %v809_v11  ;;  %v252_v19 = vrot.slane %v794_v2, %v244_v9  ;;  %v276_v25 = vrot.slane %v794_v2, %v814_v15  ;;  %v355_v32 = vld [vmem:[#allocation2 + $0x48] sm:$0xf]  ;;  %v362_v33 = vld [vmem:[#allocation2 + $0x4c] sm:$0xf]  ;;  %v298_v37 = vld [vmem:[#allocation2 + $0x30] sm:$0xf] }
  0x3c   : > { %v366_v26 = vrot.slane %v794_v2, %v807_v10  ;;  %v390_v27 = vrot.slane %v794_v2, %v816_v16  ;;  %v309_v34 = vrot.slane %v794_v2, %v812_v13  ;;  %v305_v39 = vld [vmem:[#allocation2 + $0x34] sm:$0xf]  ;;  %v333_v40 = vrot.slane %v794_v2, %v821_v20  ;;  %v209_v42 = vld [vmem:[#allocation2 + $0xc] sm:$0xf]  ;;  %v201_v47 = vld [vmem:[#allocation2 + $0x8] sm:$0xf] }
  0x3d   : > { %v198_v29 = vmul.f32 %v197_v12, %v193_v14  ;;  %v222_v43 = vmul.f32 %v221_v18, %v217_v22  ;;  %v253_v44 = vmul.f32 %v252_v19, %v248_v24  ;;  %v264_v48 = vld [vmem:[#allocation2 + $0x24] sm:$0xf]  ;;  %v277_v50 = vmul.f32 %v276_v25, %v272_v30  ;;  %v256_v54 = vld [vmem:[#allocation2 + $0x20] sm:$0xf]  ;;  %v370_v55 = vld [vmem:[#allocation2 + $0x50] sm:$0xf] }
  0x3e   : > { %405 = vperm.xlu1 %576, %v511_v4   ;;  %v367_v52 = vmul.f32 %v366_v26, %v362_v33  ;;  %v310_v58 = vmul.f32 %v309_v34, %v305_v39  ;;  %v313_v62 = vld [vmem:[#allocation2 + $0x38] sm:$0xf]  ;;  %v378_v4 = vld [vmem:[#allocation2 + $0x54] sm:$0xf]  ;;  %v329_v19 = vld [vmem:[#allocation2 + $0x40] sm:$0xf] }
  0x3f   : > { %184 = vrot.lane.b32.xlu0 %v794_v2, %s679_s5  ;;  %v225_v22 = vld [vmem:[#allocation2 + $0x14] sm:$0xf]  ;;  %v334_v33 = vmul.f32 %v333_v40, %v329_v19  ;;  %v337_v2 = vld [vmem:[#allocation2 + $0x44] sm:$0xf]  ;;  %s425_s19 = sshll.u32 %s176_s17, 4  ;;  %s518_s20 = sshll.u32 %s724_s16, 8  ;;  %s872_s19 = int_to_ptr.vmem [resolvable:$true] %s425_s19 }
  0x40   : > { %s877_s26 = scalar_lea.hbm %s925_s3, %s518_s20  ;;  %s881_s16 = scalar_lea.sflag [#allocation4], %s174_s10 }
  0x41   : > { %s606_s24 = scalar_lea.vmem %s872_s19, 256  ;;  %p936_p9 = scmp.ne.s32.totalorder %s929_s22, 0 }
  0x42   : > { %p607_p6 = scmp.ne.s32.totalorder %s872_s19, %s606_s24  ;;  %s680_s28 = smov [#allocation5]  }
  0x43   : > { %348 = vperm.xlu0 %577, %v509_v5   ;;  %s610_s29 = sshll.u32 %s680_s28, 4  ;;  %s611_s29 = int_to_ptr.vmem [resolvable:$false] %s610_s29 }
  0x44   : > { %p608_p10 = pnand %p607_p6, %p936_p9  ;;  %s612_s30 = scalar_lea.vmem %s611_s29, 512 }
  0x45   : > { %p613_p2 = scmp.lt.s32.totalorder %s872_s19, %s611_s29  ;;  %p614_p3 = scmp.lt.s32.totalorder %s612_s30, %s606_s24 }
  0x46   : > { %p609_p12 = pneg %p608_p10 }
  0x47   : > { %p615_p4 = por %p614_p3, %p613_p2 }
  0x49   : > { %p616_p7 = pnand %p615_p4, %p609_p12 }
  0xad   : > { %v823_v21 = vpop.permute.xlu0 %182 }
  0xae   : > { %v190_v28 = vrot.slane %v823_v21, %v189_v8  ;;  %v245_v31 = vrot.slane %v823_v21, %v244_v9  ;;  %v213_v35 = vrot.slane %v823_v21, %v809_v11  ;;  %v359_v36 = vrot.slane %v823_v21, %v807_v10 }
  0xaf   : > { %v302_v38 = vrot.slane %v823_v21, %v812_v13  ;;  %v268_v45 = vrot.slane %v823_v21, %v814_v15  ;;  %v382_v56 = vrot.slane %v823_v21, %v816_v16  ;;  %v325_v63 = vrot.slane %v823_v21, %v821_v20 }
  0xb0   : > { %v191_v41 = vmul.f32 %v190_v28, %v186_v17  ;;  %v246_v49 = vmul.f32 %v245_v31, %v241_v23  ;;  %v360_v51 = vmul.f32 %v359_v36, %v355_v32  ;;  %v214_v59 = vmul.f32 %v213_v35, %v209_v42  ;;  %v386_v17 = vld [vmem:[#allocation2 + $0x58] sm:$0xf]  ;;  %v280_v28 = vld [vmem:[#allocation2 + $0x2c] sm:$0xf] }
  0xb1   : > { %v845_v46 = vpop.permute.xlu0 %184  ;;  %v303_v57 = vmul.f32 %v302_v38, %v298_v37  ;;  %v269_v3 = vmul.f32 %v268_v45, %v264_v48  ;;  %v383_v25 = vmul.f32 %v382_v56, %v378_v4 }
  0xb2   : > { %v205_v53 = vrot.slane %v845_v46, %v189_v8  ;;  %v260_v60 = vrot.slane %v845_v46, %v244_v9  ;;  %v374_v61 = vrot.slane %v845_v46, %v807_v10  ;;  %v199_v0 = vadd.f32 %v198_v29, %v191_v41  ;;  %v321_v9 = vld [vmem:[#allocation2 + $0x3c] sm:$0xf] }
  0xb3   : > { %v317_v5 = vrot.slane %v845_v46, %v812_v13  ;;  %v254_v6 = vadd.f32 %v253_v44, %v246_v49  ;;  %v368_v8 = vadd.f32 %v367_v52, %v360_v51  ;;  %v229_v10 = vrot.slane %v845_v46, %v809_v11  ;;  %v394_v44 = vld [vmem:[#allocation2 + $0x5c] sm:$0xf] }
  0xb4   : > { %v206_v1 = vmul.f32 %v205_v53, %v201_v47  ;;  %v261_v7 = vmul.f32 %v260_v60, %v256_v54  ;;  %v375_v12 = vmul.f32 %v374_v61, %v370_v55  ;;  %v311_v21 = vadd.f32 %v310_v58, %v303_v57 }
  0xb5   : > { %v318_v18 = vmul.f32 %v317_v5, %v313_v62  ;;  %v284_v13 = vrot.slane %v845_v46, %v814_v15  ;;  %v326_v29 = vmul.f32 %v325_v63, %v321_v9  ;;  %v391_v11 = vmul.f32 %v390_v27, %v386_v17  ;;  %v236_v34 = vpop.permute.xlu1 %235 }
  0xb6   : > { %v207_v14 = vadd.f32 %v206_v1, %v199_v0  ;;  %v262_v23 = vadd.f32 %v261_v7, %v254_v6  ;;  %v376_v24 = vadd.f32 %v375_v12, %v368_v8  ;;  %v230_v36 = vmul.f32 %v229_v10, %v225_v22 }
  0xb7   : > { %v319_v30 = vadd.f32 %v318_v18, %v311_v21  ;;  %v285_v38 = vmul.f32 %v284_v13, %v280_v28  ;;  %v398_v39 = vrot.slane %v845_v46, %v816_v16  ;;  %v341_v41 = vrot.slane %v845_v46, %v821_v20 }
  0xb8   : > { %v215_v26 = vadd.f32 %v214_v59, %v207_v14  ;;  %v270_v31 = vadd.f32 %v269_v3, %v262_v23  ;;  %v384_v32 = vadd.f32 %v383_v25, %v376_v24 }
  0xb9   : > { %v327_v37 = vadd.f32 %v326_v29, %v319_v30  ;;  %v292_v48 = vpop.permute.xlu1 %291  ;;  %v399_v49 = vmul.f32 %v398_v39, %v394_v44 }
  0xba   : > { %v223_v35 = vadd.f32 %v222_v43, %v215_v26  ;;  %v278_v15 = vadd.f32 %v277_v50, %v270_v31  ;;  %v392_v40 = vadd.f32 %v391_v11, %v384_v32  ;;  %v342_v50 = vmul.f32 %v341_v41, %v337_v2 }
  0xbb   : > { %v335_v45 = vadd.f32 %v334_v33, %v327_v37 }
  0xbc   : > { %v231_v42 = vadd.f32 %v230_v36, %v223_v35  ;;  %v286_v27 = vadd.f32 %v285_v38, %v278_v15  ;;  %v400_v16 = vadd.f32 %v399_v49, %v392_v40 }
  0xbd   : > { %v343_v20 = vadd.f32 %v342_v50, %v335_v45  ;;  %v406_v46 = vpop.permute.xlu1 %405 }
  0xbe   : > { %v238_v47 = vadd.f32 %v236_v34, %v231_v42  ;;  %v294_v43 = vadd.f32 %v292_v48, %v286_v27  ;;  %v408_v52 = vadd.f32 %v406_v46, %v400_v16 }
  0xc0   : > { %239 = vst [vmem:[%s176_s17] sm:$0xf] %v238_v47  ;;  %508 = vst [vmem:[%s176_s17 + $0x4] sm:$0xf] %v294_v43 }
  0xc1   : > { %512 = vst [vmem:[%s176_s17 + $0xc] sm:$0xf] %v408_v52 }
  0xc2   : > { %v349_v51 = vpop.permute.xlu0 %348 }
  0xc3   : > { %v351_v53 = vadd.f32 %v349_v51, %v343_v20 }
  0xc5   : > { %510 = vst [vmem:[%s176_s17 + $0x8] sm:$0xf] %v351_v53 }
  0xc6   : > { %619 = shalt.err (!%p616_p7)
}
  0xc7   : > { %s620_s4 = scalar_lea.hbm %s877_s26, 256  ;;  %s624_s7 = scalar_lea.hbm %s925_s3, 512 }
  0xc8   : > { %p621_p8 = scmp.ne.s32.totalorder %s877_s26, %s620_s4  ;;  %p625_p1 = scmp.lt.u32.totalorder %s877_s26, %s925_s3 }
  0xc9   : > { %p626_p0 = scmp.lt.u32.totalorder %s624_s7, %s620_s4  ;;  %p628_p6 = scmp.lt.u32.totalorder %s620_s4, %s877_s26 }
  0xca   : > { %p622_p11 = pnand %p621_p8, %p936_p9 }
  0xcb   : > { %p627_p5 = por %p626_p0, %p625_p1 }
  0xcc   : > { %p623_p13 = pneg %p622_p11 }
  0xcd   : > { %p629_p10 = por %p628_p6, %p627_p5 }
  0xcf   : > { %p630_p12 = pnand %p629_p10, %p623_p13 }
  0xd1   : > { %633 = shalt.err (!%p630_p12)
}
  0xd2   : > { %s681_s10 = smov 64   ;;  %s682_s11 = smov 4  }
  0xd3   : > { %523 = dma.vmem_to_hbm [thread:$0]  (%p936_p9), %s872_s19, 256, %s877_s26, %s881_s16, %s681_s10, %s681_s10, %s682_s11  }
  0xd4 PF: > { %p535_p2 = scmp.ge.s32.totalorder %s672_s15, 2  ;;  %s440_s17 = sand.u32 1, %s660_s12  }
  0xd5   : > { %p937_p3 = scmp.ne.s32.totalorder %s930_s23, 0  ;;  %s441_s20 = scalar_lea.sflag [#allocation4], %s440_s17 }
  0xd7   : > { %p530_p4 = pnand %p535_p2, %p937_p3 }
  0xd9   : > { %655 = dma.done.wait (!%p530_p4), %s441_s20, 256  }
  0xda   : > { %657 = vsyncadd (!%p530_p4), %s441_s20, 4294967040  ;;  %p14_p7 = scmp.ge.s32.totalorder %s728_s18, 4   ;;  %s938_s12 = smov %s664_s13 }
  0xdb   : > { %s939_s13 = smov %s668_s14  ;;  %s940_s14 = smov %s739_s21 }
  0xdc   : > { %s941_s15 = smov %s728_s18  ;;  %16 = sbr.rel (!%p14_p7) target bundleno = 4 (0x4), region = 101 }
  0xe3   :  { %446 = vsyncpa [#allocation3], 1 }
  0xe4   :  { %448 = vsyncpa [#allocation3 + $0x1], 1 }
  0xe5   :  { %449 = vsyncpa [#allocation4], 1 }
  0xe6   :  { %451 = vsyncpa [#allocation4 + $0x1], 1 }

</bundles_post_ra>
